<compile_context>
chip_gen: v7x
topology: tpu7x:2x2x1
jax: 0.10.0
libtpu: 0.0.40
codegen_flags: <defaults>
</compile_context>

<pallas_src>
import functools

import jax
import jax.numpy as jnp
from jax.experimental import pallas as pl
from jax.experimental.pallas import tpu as pltpu

LN_EPS = 1e-5  # PyTorch nn.LayerNorm default


def _round_up(v, m):
    return (v + m - 1) // m * m


def value_head_kernel(x_ref,
                      w1_ref, b1_ref, g1_ref, be1_ref,
                      w2_ref, b2_ref, g2_ref, be2_ref,
                      wo_ref, bo_ref,
                      out_ref, *, res_num, d_real):
    dp = x_ref.shape[-1]
    x = x_ref[...].astype(jnp.float32)      # (TB, Dp) activations kept in f32
    mm_dtype = w1_ref.dtype                 # bf16 (or f32) MXU input dtype
    inv_d = 1.0 / d_real

    if d_real != dp:
        lane_mask = (jax.lax.broadcasted_iota(jnp.int32, (1, dp), 1)
                     < d_real).astype(jnp.float32)
    else:
        lane_mask = None

    def layernorm(h, gamma, beta):
        # LayerNorm over the real D lanes only.  Padded lanes of h are exactly
        # zero and gamma/beta are zero-padded, so padded lanes stay zero.
        mean = jnp.sum(h, axis=-1, keepdims=True) * inv_d
        centered = h - mean
        if lane_mask is not None:
            centered = centered * lane_mask
        var = jnp.sum(centered * centered, axis=-1, keepdims=True) * inv_d
        return centered * jax.lax.rsqrt(var + LN_EPS) * gamma + beta

    # res_num is small & static -> unrolled Python loop; all weights resident.
    # TODO(synk): if res_num * Dp * Dp weights approach ~32-48 MiB (v7x), move
    # r onto an "arbitrary" grid axis with (1, Dp, Dp) weight blocks and carry
    # x in a VMEM scratch accumulator instead of keeping all blocks resident.
    for r in range(res_num):
        residual = x
        # fc1: Linear -> LN -> ReLU
        h = jnp.dot(x.astype(mm_dtype), w1_ref[r],
                    preferred_element_type=jnp.float32) + b1_ref[r]
        h = layernorm(h, g1_ref[r], be1_ref[r])
        h = jnp.maximum(h, 0.0)
        # fc2: Linear -> LN (no activation)
        h = jnp.dot(h.astype(mm_dtype), w2_ref[r],
                    preferred_element_type=jnp.float32) + b2_ref[r]
        h = layernorm(h, g2_ref[r], be2_ref[r])
        # residual add + ReLU
        x = jnp.maximum(h + residual, 0.0)

    # Output head: Linear(D -> 1).  Contract the lane dim of both operands
    # ("q @ k.T" pattern) so per-row scalars land lane-dense in a (1, TB) row:
    # no relayout, no width-1 masked stores, MXU is idle in the epilogue anyway.
    out = jnp.einsum("od,td->ot", wo_ref[...], x.astype(mm_dtype),
                     preferred_element_type=jnp.float32)
    out_ref[...] = (out + bo_ref[0]).astype(out_ref.dtype)


def prepare_params(params, *, d_pad, compute_dtype):
    """Pad feature dim to d_pad and cast matmul weights to compute_dtype."""
    d = params["w1"].shape[1]
    pad_v = ((0, 0), (0, d_pad - d))
    pad_m = ((0, 0), (0, d_pad - d), (0, d_pad - d))
    f32 = jnp.float32
    return {
        "w1": jnp.pad(params["w1"], pad_m).astype(compute_dtype),
        "w2": jnp.pad(params["w2"], pad_m).astype(compute_dtype),
        "b1": jnp.pad(params["b1"], pad_v).astype(f32),
        "g1": jnp.pad(params["g1"], pad_v).astype(f32),
        "be1": jnp.pad(params["be1"], pad_v).astype(f32),
        "b2": jnp.pad(params["b2"], pad_v).astype(f32),
        "g2": jnp.pad(params["g2"], pad_v).astype(f32),
        "be2": jnp.pad(params["be2"], pad_v).astype(f32),
        # (D, 1) -> lane-dense (1, d_pad) row for the output head
        "wo": jnp.pad(params["wo"][:, 0], (0, d_pad - d))[None, :].astype(compute_dtype),
        "bo": params["bo"].astype(f32),           # (1,), lives in SMEM
    }


def value_head_forward(x, params, *, res_num, compute_dtype=jnp.bfloat16,
                       batch_tile=256):
    """x: (B, D) float32 -> (B,) float32 (squeeze(1) done in glue)."""
    B, D = x.shape
    Dp = max(128, _round_up(D, 128))             # lane-padded feature dim
    TB = min(batch_tile, _round_up(B, 8))        # batch tile (multiple of 8)
    Bp = _round_up(B, TB)
    num_tiles = Bp // TB

    p = prepare_params(params, d_pad=Dp, compute_dtype=compute_dtype)
    xp = jnp.pad(x.astype(jnp.float32), ((0, Bp - B), (0, Dp - D)))

    kernel = functools.partial(value_head_kernel, res_num=res_num, d_real=D)

    # VMEM budget from actual buffer sizes (2x headroom), not a hard-coded
    # 64 MiB: weights resident once + double-buffered x/out tiles + f32 temps.
    w_item = jnp.dtype(compute_dtype).itemsize
    weight_bytes = (res_num * 2 * Dp * Dp * w_item
                    + res_num * 6 * Dp * 4 + Dp * w_item)
    act_bytes = 2 * TB * Dp * 4 + 2 * max(TB, 128) * 4
    scratch_bytes = 6 * TB * Dp * 4
    vmem_limit = int(min(max(2 * (weight_bytes + act_bytes + scratch_bytes),
                             16 << 20), 100 << 20))

    flops = 2 * Bp * res_num * 2 * Dp * Dp + 2 * Bp * Dp
    bytes_accessed = int(xp.nbytes + sum(v.nbytes for v in p.values()) + Bp * 4)
    cost = pl.CostEstimate(flops=int(flops),
                           transcendentals=int(Bp * res_num * 2),  # rsqrt per LN
                           bytes_accessed=bytes_accessed)

    resident3 = pl.BlockSpec((res_num, Dp, Dp), lambda i: (0, 0, 0))
    resident2 = pl.BlockSpec((res_num, Dp), lambda i: (0, 0))

    out = pl.pallas_call(
        kernel,
        out_shape=jax.ShapeDtypeStruct((1, Bp), jnp.float32),
        grid=(num_tiles,),
        in_specs=[
            pl.BlockSpec((TB, Dp), lambda i: (i, 0)),            # x (streamed)
            resident3, resident2, resident2, resident2,          # w1,b1,g1,be1
            resident3, resident2, resident2, resident2,          # w2,b2,g2,be2
            pl.BlockSpec((1, Dp), lambda i: (0, 0)),             # wo row
            pl.BlockSpec(memory_space=pltpu.MemorySpace.SMEM),   # bo scalar
        ],
        out_specs=pl.BlockSpec((1, TB), lambda i: (0, i)),       # lane-dense out
        compiler_params=pltpu.CompilerParams(
            dimension_semantics=("parallel",),
            vmem_limit_bytes=vmem_limit),
        cost_estimate=cost,
    )(xp,
      p["w1"], p["b1"], p["g1"], p["be1"],
      p["w2"], p["b2"], p["g2"], p["be2"],
      p["wo"], p["bo"])
    return out[0, :B]


def init_params(key, res_num, embedding_dim):
    D = embedding_dim
    ks = jax.random.split(key, 4)
    scale = 1.0 / jnp.sqrt(D)
    return {
        "w1": jax.random.uniform(ks[0], (res_num, D, D), jnp.float32, -scale, scale),
        "b1": jnp.zeros((res_num, D), jnp.float32),
        "g1": jnp.ones((res_num, D), jnp.float32),
        "be1": jnp.zeros((res_num, D), jnp.float32),
        "w2": jax.random.uniform(ks[1], (res_num, D, D), jnp.float32, -scale, scale),
        "b2": jnp.zeros((res_num, D), jnp.float32),
        "g2": jnp.ones((res_num, D), jnp.float32),
        "be2": jnp.zeros((res_num, D), jnp.float32),
        "wo": jax.random.uniform(ks[2], (D, 1), jnp.float32, -scale, scale),
        "bo": jax.random.uniform(ks[3], (1,), jnp.float32, -scale, scale),
    }


def _layernorm_ref(h, gamma, beta):
    mean = jnp.mean(h, axis=-1, keepdims=True)
    centered = h - mean
    var = jnp.mean(centered * centered, axis=-1, keepdims=True)
    return centered * jax.lax.rsqrt(var + LN_EPS) * gamma + beta


def value_head_reference(x, params, *, res_num):
    """Pure-JAX reference mirroring the PyTorch module."""
    x = x.astype(jnp.float32)
    for r in range(res_num):
        residual = x
        h = x @ params["w1"][r] + params["b1"][r]
        h = _layernorm_ref(h, params["g1"][r], params["be1"][r])
        h = jnp.maximum(h, 0.0)
        h = h @ params["w2"][r] + params["b2"][r]
        h = _layernorm_ref(h, params["g2"][r], params["be2"][r])
        x = jnp.maximum(h + residual, 0.0)
    out = x @ params["wo"] + params["bo"]
    return out[:, 0]


if __name__ == "__main__":
    RES_NUM = 2
    EMBEDDING_DIM = 32
    BATCH = 8

    key = jax.random.PRNGKey(0)
    kx, kp = jax.random.split(key)
    x = jax.random.normal(kx, (BATCH, EMBEDDING_DIM), jnp.float32)
    params = init_params(kp, RES_NUM, EMBEDDING_DIM)

    ref = value_head_reference(x, params, res_num=RES_NUM)

    # f32 matmul path: tight comparison against the pure-JAX reference.
    out_f32 = value_head_forward(x, params, res_num=RES_NUM,
                                 compute_dtype=jnp.float32)
    out_f32 = jax.block_until_ready(out_f32)
    assert out_f32.shape == (BATCH,)
    assert jnp.allclose(out_f32, ref, atol=1e-5, rtol=1e-5)

    # bf16 matmul path (default fast path): looser tolerance.
    out_bf16 = value_head_forward(x, params, res_num=RES_NUM,
                                  compute_dtype=jnp.bfloat16)
    out_bf16 = jax.block_until_ready(out_bf16)
    assert out_bf16.shape == (BATCH,)
    assert jnp.allclose(out_bf16, ref, atol=1e-1, rtol=1e-1)

    print("KERNEL_OK")
</pallas_src>

<mosaic_0001>
module attributes {stable_mosaic.version = 11 : i64} {
  func.func @value_head_kernel(%arg0: i32, %arg1: memref<8x128xf32, #tpu.memory_space<vmem>>, %arg2: memref<2x128x128xf32, #tpu.memory_space<vmem>>, %arg3: memref<2x128xf32, #tpu.memory_space<vmem>>, %arg4: memref<2x128xf32, #tpu.memory_space<vmem>>, %arg5: memref<2x128xf32, #tpu.memory_space<vmem>>, %arg6: memref<2x128x128xf32, #tpu.memory_space<vmem>>, %arg7: memref<2x128xf32, #tpu.memory_space<vmem>>, %arg8: memref<2x128xf32, #tpu.memory_space<vmem>>, %arg9: memref<2x128xf32, #tpu.memory_space<vmem>>, %arg10: memref<1x128xf32, #tpu.memory_space<vmem>>, %arg11: memref<1xf32, #tpu.memory_space<smem>>, %arg12: memref<1x8xf32, #tpu.memory_space<vmem>>) attributes {dimension_semantics = [#tpu.dimension_semantics<parallel>], iteration_bounds = array<i64: 1>, scalar_prefetch = 0 : i64, scratch_operands = 0 : i64, tpu.core_type = #tpu.core_type<tc>, window_params = [{transform_indices = @transform_0, window_bounds = array<i64: 8, 128>}, {pipeline_mode = #tpu.pipeline_mode<synchronous>, transform_indices = @transform_1, window_bounds = array<i64: 2, 128, 128>}, {pipeline_mode = #tpu.pipeline_mode<synchronous>, transform_indices = @transform_2, window_bounds = array<i64: 2, 128>}, {pipeline_mode = #tpu.pipeline_mode<synchronous>, transform_indices = @transform_3, window_bounds = array<i64: 2, 128>}, {pipeline_mode = #tpu.pipeline_mode<synchronous>, transform_indices = @transform_4, window_bounds = array<i64: 2, 128>}, {pipeline_mode = #tpu.pipeline_mode<synchronous>, transform_indices = @transform_5, window_bounds = array<i64: 2, 128, 128>}, {pipeline_mode = #tpu.pipeline_mode<synchronous>, transform_indices = @transform_6, window_bounds = array<i64: 2, 128>}, {pipeline_mode = #tpu.pipeline_mode<synchronous>, transform_indices = @transform_7, window_bounds = array<i64: 2, 128>}, {pipeline_mode = #tpu.pipeline_mode<synchronous>, transform_indices = @transform_8, window_bounds = array<i64: 2, 128>}, {pipeline_mode = #tpu.pipeline_mode<synchronous>, transform_indices = @transform_9, window_bounds = array<i64: 1, 128>}, {transform_indices = @transform_10, window_bounds = array<i64: 1>}, {transform_indices = @transform_11, window_bounds = array<i64: 1, 8>}]} {
    %c0 = arith.constant 0 : index
    %c0_0 = arith.constant 0 : index
    %0 = vector.load %arg1[%c0, %c0_0] : memref<8x128xf32, #tpu.memory_space<vmem>>, vector<8x128xf32>
    %1 = tpu.iota {dimensions = array<i32: 1>} : vector<1x128xi32>
    %c32_i32 = arith.constant 32 : i32
    %2 = vector.broadcast %c32_i32 : i32 to vector<1x128xi32>
    %3 = arith.cmpi slt, %1, %2 : vector<1x128xi32>
    %4 = arith.extui %3 : vector<1x128xi1> to vector<1x128xi32>
    %5 = arith.sitofp %4 : vector<1x128xi32> to vector<1x128xf32>
    %c0_1 = arith.constant 0 : index
    %c0_2 = arith.constant 0 : index
    %c0_3 = arith.constant 0 : index
    %6 = vector.load %arg2[%c0_1, %c0_2, %c0_3] : memref<2x128x128xf32, #tpu.memory_space<vmem>>, vector<1x128x128xf32>
    %7 = vector.shape_cast %6 : vector<1x128x128xf32> to vector<128x128xf32>
    %cst = arith.constant dense<0.000000e+00> : vector<8x128xf32>
    %8 = tpu.matmul %0, %7, %cst {dimension_numbers = #tpu.dot_dimension_numbers<[1], [0], [0], [1], [0, 0, 1, 1], [], []>} : vector<8x128xf32>, vector<128x128xf32>, vector<8x128xf32> -> vector<8x128xf32>
    %c0_4 = arith.constant 0 : index
    %c0_5 = arith.constant 0 : index
    %9 = vector.load %arg3[%c0_4, %c0_5] : memref<2x128xf32, #tpu.memory_space<vmem>>, vector<1x128xf32>
    %10 = vector.shape_cast %9 : vector<1x128xf32> to vector<128xf32>
    %11 = vector.shape_cast %10 : vector<128xf32> to vector<1x128xf32>
    %12 = vector.broadcast %11 : vector<1x128xf32> to vector<8x128xf32>
    %13 = arith.addf %8, %12 : vector<8x128xf32>
    %c0_6 = arith.constant 0 : index
    %c0_7 = arith.constant 0 : index
    %14 = vector.load %arg4[%c0_6, %c0_7] : memref<2x128xf32, #tpu.memory_space<vmem>>, vector<1x128xf32>
    %15 = vector.shape_cast %14 : vector<1x128xf32> to vector<128xf32>
    %c0_8 = arith.constant 0 : index
    %c0_9 = arith.constant 0 : index
    %16 = vector.load %arg5[%c0_8, %c0_9] : memref<2x128xf32, #tpu.memory_space<vmem>>, vector<1x128xf32>
    %17 = vector.shape_cast %16 : vector<1x128xf32> to vector<128xf32>
    %cst_10 = arith.constant dense<0.000000e+00> : vector<8xf32>
    %18 = vector.multi_reduction <add>, %13, %cst_10 [1] : vector<8x128xf32> to vector<8xf32>
    %19 = vector.shape_cast %18 : vector<8xf32> to vector<8x1xf32>
    %cst_11 = arith.constant 3.125000e-02 : f32
    %20 = vector.broadcast %cst_11 : f32 to vector<8x1xf32>
    %21 = arith.mulf %19, %20 : vector<8x1xf32>
    %22 = vector.broadcast %21 : vector<8x1xf32> to vector<8x128xf32>
    %23 = arith.subf %13, %22 : vector<8x128xf32>
    %24 = vector.broadcast %5 : vector<1x128xf32> to vector<8x128xf32>
    %25 = arith.mulf %23, %24 : vector<8x128xf32>
    %26 = arith.mulf %25, %25 : vector<8x128xf32>
    %cst_12 = arith.constant dense<0.000000e+00> : vector<8xf32>
    %27 = vector.multi_reduction <add>, %26, %cst_12 [1] : vector<8x128xf32> to vector<8xf32>
    %28 = vector.shape_cast %27 : vector<8xf32> to vector<8x1xf32>
    %cst_13 = arith.constant 3.125000e-02 : f32
    %29 = vector.broadcast %cst_13 : f32 to vector<8x1xf32>
    %30 = arith.mulf %28, %29 : vector<8x1xf32>
    %cst_14 = arith.constant 9.99999974E-6 : f32
    %31 = vector.broadcast %cst_14 : f32 to vector<8x1xf32>
    %32 = arith.addf %30, %31 : vector<8x1xf32>
    %33 = math.rsqrt %32 : vector<8x1xf32>
    %34 = vector.broadcast %33 : vector<8x1xf32> to vector<8x128xf32>
    %35 = arith.mulf %25, %34 : vector<8x128xf32>
    %36 = vector.shape_cast %15 : vector<128xf32> to vector<1x128xf32>
    %37 = vector.broadcast %36 : vector<1x128xf32> to vector<8x128xf32>
    %38 = arith.mulf %35, %37 : vector<8x128xf32>
    %39 = vector.shape_cast %17 : vector<128xf32> to vector<1x128xf32>
    %40 = vector.broadcast %39 : vector<1x128xf32> to vector<8x128xf32>
    %41 = arith.addf %38, %40 : vector<8x128xf32>
    %cst_15 = arith.constant 0.000000e+00 : f32
    %42 = vector.broadcast %cst_15 : f32 to vector<8x128xf32>
    %43 = arith.maximumf %41, %42 : vector<8x128xf32>
    %c0_16 = arith.constant 0 : index
    %c0_17 = arith.constant 0 : index
    %c0_18 = arith.constant 0 : index
    %44 = vector.load %arg6[%c0_16, %c0_17, %c0_18] : memref<2x128x128xf32, #tpu.memory_space<vmem>>, vector<1x128x128xf32>
    %45 = vector.shape_cast %44 : vector<1x128x128xf32> to vector<128x128xf32>
    %cst_19 = arith.constant dense<0.000000e+00> : vector<8x128xf32>
    %46 = tpu.matmul %43, %45, %cst_19 {dimension_numbers = #tpu.dot_dimension_numbers<[1], [0], [0], [1], [0, 0, 1, 1], [], []>} : vector<8x128xf32>, vector<128x128xf32>, vector<8x128xf32> -> vector<8x128xf32>
    %c0_20 = arith.constant 0 : index
    %c0_21 = arith.constant 0 : index
    %47 = vector.load %arg7[%c0_20, %c0_21] : memref<2x128xf32, #tpu.memory_space<vmem>>, vector<1x128xf32>
    %48 = vector.shape_cast %47 : vector<1x128xf32> to vector<128xf32>
    %49 = vector.shape_cast %48 : vector<128xf32> to vector<1x128xf32>
    %50 = vector.broadcast %49 : vector<1x128xf32> to vector<8x128xf32>
    %51 = arith.addf %46, %50 : vector<8x128xf32>
    %c0_22 = arith.constant 0 : index
    %c0_23 = arith.constant 0 : index
    %52 = vector.load %arg8[%c0_22, %c0_23] : memref<2x128xf32, #tpu.memory_space<vmem>>, vector<1x128xf32>
    %53 = vector.shape_cast %52 : vector<1x128xf32> to vector<128xf32>
    %c0_24 = arith.constant 0 : index
    %c0_25 = arith.constant 0 : index
    %54 = vector.load %arg9[%c0_24, %c0_25] : memref<2x128xf32, #tpu.memory_space<vmem>>, vector<1x128xf32>
    %55 = vector.shape_cast %54 : vector<1x128xf32> to vector<128xf32>
    %cst_26 = arith.constant dense<0.000000e+00> : vector<8xf32>
    %56 = vector.multi_reduction <add>, %51, %cst_26 [1] : vector<8x128xf32> to vector<8xf32>
    %57 = vector.shape_cast %56 : vector<8xf32> to vector<8x1xf32>
    %cst_27 = arith.constant 3.125000e-02 : f32
    %58 = vector.broadcast %cst_27 : f32 to vector<8x1xf32>
    %59 = arith.mulf %57, %58 : vector<8x1xf32>
    %60 = vector.broadcast %59 : vector<8x1xf32> to vector<8x128xf32>
    %61 = arith.subf %51, %60 : vector<8x128xf32>
    %62 = vector.broadcast %5 : vector<1x128xf32> to vector<8x128xf32>
    %63 = arith.mulf %61, %62 : vector<8x128xf32>
    %64 = arith.mulf %63, %63 : vector<8x128xf32>
    %cst_28 = arith.constant dense<0.000000e+00> : vector<8xf32>
    %65 = vector.multi_reduction <add>, %64, %cst_28 [1] : vector<8x128xf32> to vector<8xf32>
    %66 = vector.shape_cast %65 : vector<8xf32> to vector<8x1xf32>
    %cst_29 = arith.constant 3.125000e-02 : f32
    %67 = vector.broadcast %cst_29 : f32 to vector<8x1xf32>
    %68 = arith.mulf %66, %67 : vector<8x1xf32>
    %cst_30 = arith.constant 9.99999974E-6 : f32
    %69 = vector.broadcast %cst_30 : f32 to vector<8x1xf32>
    %70 = arith.addf %68, %69 : vector<8x1xf32>
    %71 = math.rsqrt %70 : vector<8x1xf32>
    %72 = vector.broadcast %71 : vector<8x1xf32> to vector<8x128xf32>
    %73 = arith.mulf %63, %72 : vector<8x128xf32>
    %74 = vector.shape_cast %53 : vector<128xf32> to vector<1x128xf32>
    %75 = vector.broadcast %74 : vector<1x128xf32> to vector<8x128xf32>
    %76 = arith.mulf %73, %75 : vector<8x128xf32>
    %77 = vector.shape_cast %55 : vector<128xf32> to vector<1x128xf32>
    %78 = vector.broadcast %77 : vector<1x128xf32> to vector<8x128xf32>
    %79 = arith.addf %76, %78 : vector<8x128xf32>
    %80 = arith.addf %79, %0 : vector<8x128xf32>
    %cst_31 = arith.constant 0.000000e+00 : f32
    %81 = vector.broadcast %cst_31 : f32 to vector<8x128xf32>
    %82 = arith.maximumf %80, %81 : vector<8x128xf32>
    %c1 = arith.constant 1 : index
    %c0_32 = arith.constant 0 : index
    %c0_33 = arith.constant 0 : index
    %83 = vector.load %arg2[%c1, %c0_32, %c0_33] : memref<2x128x128xf32, #tpu.memory_space<vmem>>, vector<1x128x128xf32>
    %84 = vector.shape_cast %83 : vector<1x128x128xf32> to vector<128x128xf32>
    %cst_34 = arith.constant dense<0.000000e+00> : vector<8x128xf32>
    %85 = tpu.matmul %82, %84, %cst_34 {dimension_numbers = #tpu.dot_dimension_numbers<[1], [0], [0], [1], [0, 0, 1, 1], [], []>} : vector<8x128xf32>, vector<128x128xf32>, vector<8x128xf32> -> vector<8x128xf32>
    %c1_35 = arith.constant 1 : index
    %c0_36 = arith.constant 0 : index
    %86 = vector.load %arg3[%c1_35, %c0_36] : memref<2x128xf32, #tpu.memory_space<vmem>>, vector<1x128xf32>
    %87 = vector.shape_cast %86 : vector<1x128xf32> to vector<128xf32>
    %88 = vector.shape_cast %87 : vector<128xf32> to vector<1x128xf32>
    %89 = vector.broadcast %88 : vector<1x128xf32> to vector<8x128xf32>
    %90 = arith.addf %85, %89 : vector<8x128xf32>
    %c1_37 = arith.constant 1 : index
    %c0_38 = arith.constant 0 : index
    %91 = vector.load %arg4[%c1_37, %c0_38] : memref<2x128xf32, #tpu.memory_space<vmem>>, vector<1x128xf32>
    %92 = vector.shape_cast %91 : vector<1x128xf32> to vector<128xf32>
    %c1_39 = arith.constant 1 : index
    %c0_40 = arith.constant 0 : index
    %93 = vector.load %arg5[%c1_39, %c0_40] : memref<2x128xf32, #tpu.memory_space<vmem>>, vector<1x128xf32>
    %94 = vector.shape_cast %93 : vector<1x128xf32> to vector<128xf32>
    %cst_41 = arith.constant dense<0.000000e+00> : vector<8xf32>
    %95 = vector.multi_reduction <add>, %90, %cst_41 [1] : vector<8x128xf32> to vector<8xf32>
    %96 = vector.shape_cast %95 : vector<8xf32> to vector<8x1xf32>
    %cst_42 = arith.constant 3.125000e-02 : f32
    %97 = vector.broadcast %cst_42 : f32 to vector<8x1xf32>
    %98 = arith.mulf %96, %97 : vector<8x1xf32>
    %99 = vector.broadcast %98 : vector<8x1xf32> to vector<8x128xf32>
    %100 = arith.subf %90, %99 : vector<8x128xf32>
    %101 = vector.broadcast %5 : vector<1x128xf32> to vector<8x128xf32>
    %102 = arith.mulf %100, %101 : vector<8x128xf32>
    %103 = arith.mulf %102, %102 : vector<8x128xf32>
    %cst_43 = arith.constant dense<0.000000e+00> : vector<8xf32>
    %104 = vector.multi_reduction <add>, %103, %cst_43 [1] : vector<8x128xf32> to vector<8xf32>
    %105 = vector.shape_cast %104 : vector<8xf32> to vector<8x1xf32>
    %cst_44 = arith.constant 3.125000e-02 : f32
    %106 = vector.broadcast %cst_44 : f32 to vector<8x1xf32>
    %107 = arith.mulf %105, %106 : vector<8x1xf32>
    %cst_45 = arith.constant 9.99999974E-6 : f32
    %108 = vector.broadcast %cst_45 : f32 to vector<8x1xf32>
    %109 = arith.addf %107, %108 : vector<8x1xf32>
    %110 = math.rsqrt %109 : vector<8x1xf32>
    %111 = vector.broadcast %110 : vector<8x1xf32> to vector<8x128xf32>
    %112 = arith.mulf %102, %111 : vector<8x128xf32>
    %113 = vector.shape_cast %92 : vector<128xf32> to vector<1x128xf32>
    %114 = vector.broadcast %113 : vector<1x128xf32> to vector<8x128xf32>
    %115 = arith.mulf %112, %114 : vector<8x128xf32>
    %116 = vector.shape_cast %94 : vector<128xf32> to vector<1x128xf32>
    %117 = vector.broadcast %116 : vector<1x128xf32> to vector<8x128xf32>
    %118 = arith.addf %115, %117 : vector<8x128xf32>
    %cst_46 = arith.constant 0.000000e+00 : f32
    %119 = vector.broadcast %cst_46 : f32 to vector<8x128xf32>
    %120 = arith.maximumf %118, %119 : vector<8x128xf32>
    %c1_47 = arith.constant 1 : index
    %c0_48 = arith.constant 0 : index
    %c0_49 = arith.constant 0 : index
    %121 = vector.load %arg6[%c1_47, %c0_48, %c0_49] : memref<2x128x128xf32, #tpu.memory_space<vmem>>, vector<1x128x128xf32>
    %122 = vector.shape_cast %121 : vector<1x128x128xf32> to vector<128x128xf32>
    %cst_50 = arith.constant dense<0.000000e+00> : vector<8x128xf32>
    %123 = tpu.matmul %120, %122, %cst_50 {dimension_numbers = #tpu.dot_dimension_numbers<[1], [0], [0], [1], [0, 0, 1, 1], [], []>} : vector<8x128xf32>, vector<128x128xf32>, vector<8x128xf32> -> vector<8x128xf32>
    %c1_51 = arith.constant 1 : index
    %c0_52 = arith.constant 0 : index
    %124 = vector.load %arg7[%c1_51, %c0_52] : memref<2x128xf32, #tpu.memory_space<vmem>>, vector<1x128xf32>
    %125 = vector.shape_cast %124 : vector<1x128xf32> to vector<128xf32>
    %126 = vector.shape_cast %125 : vector<128xf32> to vector<1x128xf32>
    %127 = vector.broadcast %126 : vector<1x128xf32> to vector<8x128xf32>
    %128 = arith.addf %123, %127 : vector<8x128xf32>
    %c1_53 = arith.constant 1 : index
    %c0_54 = arith.constant 0 : index
    %129 = vector.load %arg8[%c1_53, %c0_54] : memref<2x128xf32, #tpu.memory_space<vmem>>, vector<1x128xf32>
    %130 = vector.shape_cast %129 : vector<1x128xf32> to vector<128xf32>
    %c1_55 = arith.constant 1 : index
    %c0_56 = arith.constant 0 : index
    %131 = vector.load %arg9[%c1_55, %c0_56] : memref<2x128xf32, #tpu.memory_space<vmem>>, vector<1x128xf32>
    %132 = vector.shape_cast %131 : vector<1x128xf32> to vector<128xf32>
    %cst_57 = arith.constant dense<0.000000e+00> : vector<8xf32>
    %133 = vector.multi_reduction <add>, %128, %cst_57 [1] : vector<8x128xf32> to vector<8xf32>
    %134 = vector.shape_cast %133 : vector<8xf32> to vector<8x1xf32>
    %cst_58 = arith.constant 3.125000e-02 : f32
    %135 = vector.broadcast %cst_58 : f32 to vector<8x1xf32>
    %136 = arith.mulf %134, %135 : vector<8x1xf32>
    %137 = vector.broadcast %136 : vector<8x1xf32> to vector<8x128xf32>
    %138 = arith.subf %128, %137 : vector<8x128xf32>
    %139 = vector.broadcast %5 : vector<1x128xf32> to vector<8x128xf32>
    %140 = arith.mulf %138, %139 : vector<8x128xf32>
    %141 = arith.mulf %140, %140 : vector<8x128xf32>
    %cst_59 = arith.constant dense<0.000000e+00> : vector<8xf32>
    %142 = vector.multi_reduction <add>, %141, %cst_59 [1] : vector<8x128xf32> to vector<8xf32>
    %143 = vector.shape_cast %142 : vector<8xf32> to vector<8x1xf32>
    %cst_60 = arith.constant 3.125000e-02 : f32
    %144 = vector.broadcast %cst_60 : f32 to vector<8x1xf32>
    %145 = arith.mulf %143, %144 : vector<8x1xf32>
    %cst_61 = arith.constant 9.99999974E-6 : f32
    %146 = vector.broadcast %cst_61 : f32 to vector<8x1xf32>
    %147 = arith.addf %145, %146 : vector<8x1xf32>
    %148 = math.rsqrt %147 : vector<8x1xf32>
    %149 = vector.broadcast %148 : vector<8x1xf32> to vector<8x128xf32>
    %150 = arith.mulf %140, %149 : vector<8x128xf32>
    %151 = vector.shape_cast %130 : vector<128xf32> to vector<1x128xf32>
    %152 = vector.broadcast %151 : vector<1x128xf32> to vector<8x128xf32>
    %153 = arith.mulf %150, %152 : vector<8x128xf32>
    %154 = vector.shape_cast %132 : vector<128xf32> to vector<1x128xf32>
    %155 = vector.broadcast %154 : vector<1x128xf32> to vector<8x128xf32>
    %156 = arith.addf %153, %155 : vector<8x128xf32>
    %157 = arith.addf %156, %82 : vector<8x128xf32>
    %cst_62 = arith.constant 0.000000e+00 : f32
    %158 = vector.broadcast %cst_62 : f32 to vector<8x128xf32>
    %159 = arith.maximumf %157, %158 : vector<8x128xf32>
    %c0_63 = arith.constant 0 : index
    %c0_64 = arith.constant 0 : index
    %160 = vector.load %arg10[%c0_63, %c0_64] : memref<1x128xf32, #tpu.memory_space<vmem>>, vector<1x128xf32>
    "tpu.trace_start"() <{level = 10 : i32, message = "od,td->ot"}> : () -> ()
    %cst_65 = arith.constant dense<0.000000e+00> : vector<1x8xf32>
    %161 = tpu.matmul %160, %159, %cst_65 {dimension_numbers = #tpu.dot_dimension_numbers<[1], [1], [0], [0], [0, 0, 1, 0], [], []>} : vector<1x128xf32>, vector<8x128xf32>, vector<1x8xf32> -> vector<1x8xf32>
    "tpu.trace_stop"() : () -> ()
    %c0_66 = arith.constant 0 : index
    %162 = memref.load %arg11[%c0_66] : memref<1xf32, #tpu.memory_space<smem>>
    %163 = vector.broadcast %162 : f32 to vector<1x8xf32>
    %164 = arith.addf %161, %163 : vector<1x8xf32>
    %c0_67 = arith.constant 0 : index
    %c0_68 = arith.constant 0 : index
    %165 = vector.load %arg12[%c0_67, %c0_68] : memref<1x8xf32, #tpu.memory_space<vmem>>, vector<1x8xf32>
    tpu.vector_store %arg12[%c0_67, %c0_68], %164 {strides = array<i32>} : memref<1x8xf32, #tpu.memory_space<vmem>>, vector<1x8xf32>,
    return
  }
  func.func @transform_0(%arg0: i32) -> (i32, i32) {
    %c0_i32 = arith.constant 0 : i32
    %c0_i32_0 = arith.constant 0 : i32
    return %arg0, %c0_i32 : i32, i32
  }
  func.func @transform_1(%arg0: i32) -> (i32, i32, i32) {
    %c0_i32 = arith.constant 0 : i32
    %c0_i32_0 = arith.constant 0 : i32
    %c0_i32_1 = arith.constant 0 : i32
    %c0_i32_2 = arith.constant 0 : i32
    return %c0_i32, %c0_i32_0, %c0_i32_1 : i32, i32, i32
  }
  func.func @transform_2(%arg0: i32) -> (i32, i32) {
    %c0_i32 = arith.constant 0 : i32
    %c0_i32_0 = arith.constant 0 : i32
    %c0_i32_1 = arith.constant 0 : i32
    return %c0_i32, %c0_i32_0 : i32, i32
  }
  func.func @transform_3(%arg0: i32) -> (i32, i32) {
    %c0_i32 = arith.constant 0 : i32
    %c0_i32_0 = arith.constant 0 : i32
    %c0_i32_1 = arith.constant 0 : i32
    return %c0_i32, %c0_i32_0 : i32, i32
  }
  func.func @transform_4(%arg0: i32) -> (i32, i32) {
    %c0_i32 = arith.constant 0 : i32
    %c0_i32_0 = arith.constant 0 : i32
    %c0_i32_1 = arith.constant 0 : i32
    return %c0_i32, %c0_i32_0 : i32, i32
  }
  func.func @transform_5(%arg0: i32) -> (i32, i32, i32) {
    %c0_i32 = arith.constant 0 : i32
    %c0_i32_0 = arith.constant 0 : i32
    %c0_i32_1 = arith.constant 0 : i32
    %c0_i32_2 = arith.constant 0 : i32
    return %c0_i32, %c0_i32_0, %c0_i32_1 : i32, i32, i32
  }
  func.func @transform_6(%arg0: i32) -> (i32, i32) {
    %c0_i32 = arith.constant 0 : i32
    %c0_i32_0 = arith.constant 0 : i32
    %c0_i32_1 = arith.constant 0 : i32
    return %c0_i32, %c0_i32_0 : i32, i32
  }
  func.func @transform_7(%arg0: i32) -> (i32, i32) {
    %c0_i32 = arith.constant 0 : i32
    %c0_i32_0 = arith.constant 0 : i32
    %c0_i32_1 = arith.constant 0 : i32
    return %c0_i32, %c0_i32_0 : i32, i32
  }
  func.func @transform_8(%arg0: i32) -> (i32, i32) {
    %c0_i32 = arith.constant 0 : i32
    %c0_i32_0 = arith.constant 0 : i32
    %c0_i32_1 = arith.constant 0 : i32
    return %c0_i32, %c0_i32_0 : i32, i32
  }
  func.func @transform_9(%arg0: i32) -> (i32, i32) {
    %c0_i32 = arith.constant 0 : i32
    %c0_i32_0 = arith.constant 0 : i32
    %c0_i32_1 = arith.constant 0 : i32
    return %c0_i32, %c0_i32_0 : i32, i32
  }
  func.func @transform_10(%arg0: i32) -> i32 {
    %c0_i32 = arith.constant 0 : i32
    %c0_i32_0 = arith.constant 0 : i32
    return %c0_i32 : i32
  }
  func.func @transform_11(%arg0: i32) -> (i32, i32) {
    %c0_i32 = arith.constant 0 : i32
    %c0_i32_0 = arith.constant 0 : i32
    return %c0_i32, %arg0 : i32, i32
  }
}

</mosaic_0001>

<bundles_post_ra>
// kernel: tpu_custom_call.1
= control target key start
LH: loop header
LB: loop body
LE: loop exit
PB: predicated region body
PF: predicated region fallthrough
CT: control target
= control target key end

     0   :  { %17 = vsyncpa [#allocation4], 0  ;;  %s1305_s0 = inlined_call_operand.hbm [shape: f32[8,128], index: 0, kind: input, shape index: {}]   ;;  %s1306_s1 = inlined_call_operand.hbm [shape: f32[2,128,128], index: 1, kind: input, shape index: {}]   ;;  %s1307_s2 = inlined_call_operand.vmem [shape: f32[2,128], index: 2, kind: input, shape index: {}]   ;;  %s1308_s3 = inlined_call_operand.vmem [shape: f32[2,128], index: 3, kind: input, shape index: {}]   ;;  %s1309_s4 = inlined_call_operand.vmem [shape: f32[2,128], index: 4, kind: input, shape index: {}]   ;;  %s1310_s5 = inlined_call_operand.hbm [shape: f32[2,128,128], index: 5, kind: input, shape index: {}]   ;;  %s1311_s6 = inlined_call_operand.vmem [shape: f32[2,128], index: 6, kind: input, shape index: {}]   ;;  %s1312_s7 = inlined_call_operand.vmem [shape: f32[2,128], index: 7, kind: input, shape index: {}]   ;;  %s1313_s8 = inlined_call_operand.vmem [shape: f32[2,128], index: 8, kind: input, shape index: {}]   ;;  %s1314_s9 = inlined_call_operand.vmem [shape: f32[1,128], index: 9, kind: input, shape index: {}]   ;;  %s1315_s10 = inlined_call_operand.<no memory space> [shape: f32[1], index: 10, kind: input, shape index: {}]   ;;  %s1316_s11 = inlined_call_operand.hbm [shape: f32[1,8], index: 11, kind: output, shape index: {}]  }
   0x1   :  { %18 = vsyncpa [#allocation7], 0 }
   0x2   :  { %19 = vsyncpa [#allocation5], 0  ;;  %s1079_s17 = smov [#allocation6]   ;;  %s985_s21 = scalar_lea.hbm %s1306_s1, 4096 }
   0x3   :  { %s35_s18 = sshll.u32 %s1079_s17, 4  ;;  %p986_p0 = scmp.ne.s32.totalorder %s1306_s1, %s985_s21  ;;  %s36_s18 = int_to_ptr.vmem [resolvable:$true] %s35_s18 }
   0x4   :  { %p989_p1 = scmp.lt.u32.totalorder %s985_s21, %s1306_s1 }
   0x6   :  { %p991_p2 = pnand %p989_p1, %p986_p0 }
   0x8   :  { %994 = shalt.err (!%p991_p2)
}
   0x9   :  { %s995_s26 = scalar_lea.vmem %s36_s18, 4096  ;;  %p1000_p4 = scmp.lt.s32.totalorder %s36_s18, %s36_s18 }
   0xa   :  { %p996_p3 = scmp.ne.s32.totalorder %s36_s18, %s995_s26  ;;  %p1001_p5 = scmp.lt.s32.totalorder %s995_s26, %s995_s26 }
   0xc   :  { %p1002_p6 = por %p1001_p5, %p1000_p4 }
   0xe   :  { %p1003_p7 = pnand %p1002_p6, %p996_p3 }
  0x10   :  { %1006 = shalt.err (!%p1003_p7)
}
  0x11   :  { %s1080_s27 = smov 128   ;;  %s1081_s28 = smov 8  }
  0x12   :  { %41 = dma.hbm_to_vmem [thread:$0]  %s1306_s1, 4096, %s36_s18, [#allocation7], %s1080_s27, %s1080_s27, %s1081_s28  }
  0x13   :  { %s1082_s12 = smov [#allocation3]   ;;  %s1083_s14 = smov [#allocation8]  }
  0x14   :  { %s26_s13 = sshll.u32 %s1082_s12, 4  ;;  %s53_s15 = sshll.u32 %s1083_s14, 4  ;;  %s27_s13 = int_to_ptr.vmem [resolvable:$true] %s26_s13  ;;  %s54_s15 = int_to_ptr.vmem [resolvable:$true] %s53_s15 }
  0x15   :  { %s1007_s19 = scalar_lea.hbm %s1305_s0, 128 }
  0x16   :  { %p1008_p8 = scmp.ne.s32.totalorder %s1305_s0, %s1007_s19  ;;  %p1011_p9 = scmp.lt.u32.totalorder %s1007_s19, %s1305_s0 }
  0x18   :  { %p1013_p10 = pnand %p1011_p9, %p1008_p8 }
  0x1a   :  { %1016 = shalt.err (!%p1013_p10)
}
  0x1b   :  { %s1017_s1 = scalar_lea.vmem %s27_s13, 128  ;;  %p1022_p12 = scmp.lt.s32.totalorder %s27_s13, %s27_s13 }
  0x1c   :  { %p1018_p11 = scmp.ne.s32.totalorder %s27_s13, %s1017_s1  ;;  %p1023_p13 = scmp.lt.s32.totalorder %s1017_s1, %s1017_s1 }
  0x1e   :  { %p1024_p0 = por %p1023_p13, %p1022_p12 }
  0x20   :  { %p1025_p1 = pnand %p1024_p0, %p1018_p11 }
  0x22   :  { %1028 = shalt.err (!%p1025_p1)
}
  0x23   :  { %29 = dma.hbm_to_vmem [thread:$0]  %s1305_s0, 128, %s27_s13, [#allocation4]  }
  0x24   :  { %s1029_s29 = scalar_lea.hbm %s1310_s5, 4096 }
  0x25   :  { %p1030_p2 = scmp.ne.s32.totalorder %s1310_s5, %s1029_s29  ;;  %p1033_p3 = scmp.lt.u32.totalorder %s1029_s29, %s1310_s5 }
  0x27   :  { %p1035_p4 = pnand %p1033_p3, %p1030_p2 }
  0x29   :  { %1038 = shalt.err (!%p1035_p4)
}
  0x2a   :  { %s1039_s17 = scalar_lea.vmem %s54_s15, 4096  ;;  %p1044_p6 = scmp.lt.s32.totalorder %s54_s15, %s54_s15 }
  0x2b   :  { %p1040_p5 = scmp.ne.s32.totalorder %s54_s15, %s1039_s17  ;;  %p1045_p7 = scmp.lt.s32.totalorder %s1039_s17, %s1039_s17 }
  0x2d   :  { %p1046_p8 = por %p1045_p7, %p1044_p6 }
  0x2f   :  { %p1047_p9 = pnand %p1046_p8, %p1040_p5 }
  0x31   :  { %1050 = shalt.err (!%p1047_p9)
}
  0x32   :  { %59 = dma.hbm_to_vmem [thread:$0]  %s1310_s5, 4096, %s54_s15, [#allocation7], %s1080_s27, %s1080_s27, %s1081_s28  }
  0x33   :  { %1073 = dma.done.wait [#allocation4], 128  }
  0x34   :  { %1074 = vsyncadd [#allocation4], 4294967168 }
  0x35   :  { %1075 = dma.done.wait [#allocation7], 8192  }
  0x36   :  { %1076 = vsyncadd [#allocation7], 4294959104  ;;  %v1084_v0 = vmov 0.0|0.0   ;;  %vm1085_vm0 = vmmov 0   ;;  %v1086_v1 = vmov 0.0   ;;  %v85_v2 = vld [vmem:[#allocation6] sm:$0xff]  ;;  %v80_v37 = vlaneseq }
  0x37   :  { %872 = vmatprep.subr.bf16.mxu0 %v1084_v0  ;;  %759 = vmatprep.mubr.msk.f32.mxu0 %vm1085_vm0, %v1086_v1  ;;  %v86_v3 = vld [vmem:[#allocation6 + $0x8] sm:$0xff]  ;;  %v87_v4 = vld [vmem:[#allocation6 + $0x10] sm:$0xff]  ;;  %v88_v6 = vld [vmem:[#allocation6 + $0x18] sm:$0xff]  ;;  %vm626_vm2 = vcmask 57344  }
  0x38   :  { %896 = vmatprep.subr.bf16.mxu1 %v1084_v0  ;;  %794 = vmatprep.mubr.msk.f32.mxu1 %vm1085_vm0, %v1086_v1  ;;  %v873_v5 = vpack.c.bf16 %v86_v3, %v85_v2  ;;  %v876_v7 = vpack.c.bf16 %v88_v6, %v87_v4  ;;  %v89_v8 = vld [vmem:[#allocation6 + $0x20] sm:$0xff]  ;;  %v90_v9 = vld [vmem:[#allocation6 + $0x28] sm:$0xff]  ;;  %v91_v11 = vld [vmem:[#allocation6 + $0x30] sm:$0xff]  ;;  %v81_v38 = vand.u32 127, %v80_v37 }
  0x39   :  { %v879_v10 = vpack.c.bf16 %v90_v9, %v89_v8  ;;  %v92_v12 = vld [vmem:[#allocation6 + $0x38] sm:$0xff]  ;;  %v93_v14 = vld [vmem:[#allocation6 + $0x40] sm:$0xff]  ;;  %v94_v15 = vld [vmem:[#allocation6 + $0x48] sm:$0xff] }
  0x3a   :  { %874 = vmatpush3.bf16.msra.mxu0 %v873_v5  ;;  %v882_v13 = vpack.c.bf16 %v92_v12, %v91_v11  ;;  %v885_v16 = vpack.c.bf16 %v94_v15, %v93_v14  ;;  %v95_v17 = vld [vmem:[#allocation6 + $0x50] sm:$0xff]  ;;  %v96_v18 = vld [vmem:[#allocation6 + $0x58] sm:$0xff]  ;;  %v97_v20 = vld [vmem:[#allocation6 + $0x60] sm:$0xff]  ;;  %vm82_vm1 = vcmp.lt.s32.totalorder %v81_v38, 32 }
  0x3b   :  { %875 = vmatprep.subr.bf16.mxu0 %v1084_v0  ;;  %v888_v19 = vpack.c.bf16 %v96_v18, %v95_v17  ;;  %v98_v21 = vld [vmem:[#allocation6 + $0x68] sm:$0xff]  ;;  %v99_v23 = vld [vmem:[#allocation6 + $0x70] sm:$0xff]  ;;  %v100_v24 = vld [vmem:[#allocation6 + $0x78] sm:$0xff]  ;;  %v1215_v41 = vsel %vm82_vm1, 1.0, %v1086_v1 }
  0x3c   :  { %v891_v22 = vpack.c.bf16 %v98_v21, %v97_v20  ;;  %v894_v25 = vpack.c.bf16 %v100_v24, %v99_v23  ;;  %v1203_v26 = vld [vmem:[#allocation3] sm:$0xff]  ;;  %v201_v31 = vld [vmem:[#allocation8] sm:$0xff]  ;;  %v202_v32 = vld [vmem:[#allocation8 + $0x8] sm:$0xff] }
  0x3d   :  { %v645_v27 = vld [vmem:[%s1307_s2] ss:$0 sm:$0xff]  ;;  %v203_v33 = vld [vmem:[#allocation8 + $0x10] sm:$0xff]  ;;  %v897_v34 = vpack.c.bf16 %v202_v32, %v201_v31  ;;  %v205_v45 = vld [vmem:[#allocation8 + $0x20] sm:$0xff] }
  0x3e   :  { %877 = vmatpush3.bf16.msra.mxu0 %v876_v7  ;;  %v204_v35 = vld [vmem:[#allocation8 + $0x18] sm:$0xff]  ;;  %v206_v46 = vld [vmem:[#allocation8 + $0x28] sm:$0xff]  ;;  %v207_v48 = vld [vmem:[#allocation8 + $0x30] sm:$0xff] }
  0x3f   :  { %878 = vmatprep.subr.bf16.mxu0 %v1084_v0  ;;  %898 = vmatpush3.bf16.msra.mxu1 %v897_v34  ;;  %v900_v36 = vpack.c.bf16 %v204_v35, %v203_v33  ;;  %v903_v47 = vpack.c.bf16 %v206_v46, %v205_v45  ;;  %v208_v49 = vld [vmem:[#allocation8 + $0x38] sm:$0xff]  ;;  %v209_v51 = vld [vmem:[#allocation8 + $0x40] sm:$0xff]  ;;  %v210_v52 = vld [vmem:[#allocation8 + $0x48] sm:$0xff] }
  0x40   :  { %899 = vmatprep.subr.bf16.mxu1 %v1084_v0  ;;  %v906_v50 = vpack.c.bf16 %v208_v49, %v207_v48  ;;  %v909_v53 = vpack.c.bf16 %v210_v52, %v209_v51  ;;  %v211_v54 = vld [vmem:[#allocation8 + $0x50] sm:$0xff]  ;;  %v212_v55 = vld [vmem:[#allocation8 + $0x58] sm:$0xff]  ;;  %v213_v57 = vld [vmem:[#allocation8 + $0x60] sm:$0xff] }
  0x41   :  { %v912_v56 = vpack.c.bf16 %v212_v55, %v211_v54  ;;  %v214_v58 = vld [vmem:[#allocation8 + $0x68] sm:$0xff]  ;;  %v215_v60 = vld [vmem:[#allocation8 + $0x70] sm:$0xff]  ;;  %v216_v61 = vld [vmem:[#allocation8 + $0x78] sm:$0xff] }
  0x42   :  { %880 = vmatpush3.bf16.msra.mxu0 %v879_v10  ;;  %v915_v59 = vpack.c.bf16 %v214_v58, %v213_v57  ;;  %v918_v62 = vpack.c.bf16 %v216_v61, %v215_v60  ;;  %v646_v5 = vld [vmem:[%s1308_s3] ss:$0 sm:$0xff]  ;;  %v319_v15 = vld [vmem:[#allocation6 + $0x80] sm:$0xff]  ;;  %v321_v17 = vld [vmem:[#allocation6 + $0x90] sm:$0xff] }
  0x43   :  { %881 = vmatprep.subr.bf16.mxu0 %v1084_v0  ;;  %901 = vmatpush3.bf16.msra.mxu1 %v900_v36  ;;  %v647_v7 = vld [vmem:[%s1309_s4] ss:$0 sm:$0xff]  ;;  %v327_v33 = vld [vmem:[#allocation6 + $0xc0] sm:$0xff]  ;;  %v328_v34 = vld [vmem:[#allocation6 + $0xc8] sm:$0xff] }
  0x44   :  { %902 = vmatprep.subr.bf16.mxu1 %v1084_v0  ;;  %v648_v11 = vld [vmem:[%s1311_s6] ss:$0 sm:$0xff]  ;;  %v933_v35 = vpack.c.bf16 %v328_v34, %v327_v33  ;;  %v329_v36 = vld [vmem:[#allocation6 + $0xd0] sm:$0xff]  ;;  %v651_v57 = vld [vmem:[%s1307_s2 + $0x1] ss:$0 sm:$0xff] }
  0x45   :  { %v326_v31 = vld [vmem:[#allocation6 + $0xb8] sm:$0xff]  ;;  %v436_v61 = vld [vmem:[#allocation8 + $0x80] sm:$0xff] }
  0x46   :  { %883 = vmatpush3.bf16.msra.mxu0 %v882_v13  ;;  %v330_v37 = vld [vmem:[#allocation6 + $0xd8] sm:$0xff] }
  0x47   :  { %884 = vmatprep.subr.bf16.mxu0 %v1084_v0  ;;  %904 = vmatpush3.bf16.msra.mxu1 %v903_v47  ;;  %v936_v38 = vpack.c.bf16 %v330_v37, %v329_v36  ;;  %v650_v52 = vld [vmem:[%s1313_s8] ss:$0 sm:$0xff]  ;;  %v653_v33 = vld [vmem:[%s1309_s4 + $0x1] ss:$0 sm:$0xff] }
  0x48   :  { %905 = vmatprep.subr.bf16.mxu1 %v1084_v0 }
  0x4a   :  { %886 = vmatpush3.bf16.msra.mxu0 %v885_v16  ;;  %v320_v16 = vld [vmem:[#allocation6 + $0x88] sm:$0xff] }
  0x4b   :  { %887 = vmatprep.subr.bf16.mxu0 %v1084_v0  ;;  %907 = vmatpush3.bf16.msra.mxu1 %v906_v50  ;;  %v921_v18 = vpack.c.bf16 %v320_v16, %v319_v15  ;;  %v649_v50 = vld [vmem:[%s1312_s7] ss:$0 sm:$0xff]  ;;  %v445_v15 = vld [vmem:[#allocation8 + $0xc8] sm:$0xff] }
  0x4c   :  { %908 = vmatprep.subr.bf16.mxu1 %v1084_v0 }
  0x4e   :  { %889 = vmatpush3.bf16.msra.mxu0 %v888_v19  ;;  %v322_v19 = vld [vmem:[#allocation6 + $0x98] sm:$0xff] }
  0x4f   :  { %890 = vmatprep.subr.bf16.mxu0 %v1084_v0  ;;  %910 = vmatpush3.bf16.msra.mxu1 %v909_v53  ;;  %v924_v20 = vpack.c.bf16 %v322_v19, %v321_v17  ;;  %v446_v17 = vld [vmem:[#allocation8 + $0xd0] sm:$0xff] }
  0x50   :  { %911 = vmatprep.subr.bf16.mxu1 %v1084_v0 }
  0x52   :  { %892 = vmatpush3.bf16.msra.mxu0 %v891_v22 }
  0x53   :  { %893 = vmatprep.subr.bf16.mxu0 %v1084_v0  ;;  %913 = vmatpush3.bf16.msra.mxu1 %v912_v56 }
  0x54   :  { %914 = vmatprep.subr.bf16.mxu1 %v1084_v0 }
  0x56   :  { %895 = vmatpush3.bf16.msra.mxu0 %v894_v25 }
  0x57   :  { %920 = vmatprep.subr.bf16.mxu0 %v1084_v0  ;;  %916 = vmatpush3.bf16.msra.mxu1 %v915_v59 }
  0x58   :  { %917 = vmatprep.subr.bf16.mxu1 %v1084_v0 }
  0x59   :  { %760 = vmatmul.mubr.f32.vlgmr.msra.gmra.mrb[0].mxu0 %v1203_v26 }
  0x5a   :  { %829 = vmatprep.mubr.msk.f32.mxu0 %vm1085_vm0, %v1086_v1  ;;  %922 = vmatpush3.bf16.msra.mxu0 %v921_v18  ;;  %v447_v18 = vld [vmem:[#allocation8 + $0xd8] sm:$0xff] }
  0x5b   :  { %919 = vmatpush3.bf16.msra.mxu1 %v918_v62  ;;  %923 = vmatprep.subr.bf16.mxu0 %v1084_v0  ;;  %v437_v62 = vld [vmem:[#allocation8 + $0x88] sm:$0xff]  ;;  %v960_v19 = vpack.c.bf16 %v447_v18, %v446_v17 }
  0x5c   :  { %944 = vmatprep.subr.bf16.mxu1 %v1084_v0 }
  0x5e   :  { %925 = vmatpush3.bf16.msra.mxu0 %v924_v20  ;;  %v448_v20 = vld [vmem:[#allocation8 + $0xe0] sm:$0xff] }
  0x5f   :  { %926 = vmatprep.subr.bf16.mxu0 %v1084_v0 }
 0x12c   :  { %v172_v28 = vpop.f32.mrb[0].mxu0 }
 0x12d   :  { %v173_v29 = vadd.f32 %v645_v27, %v172_v28  ;;  %v761_v30 = vpop.f32.mrb[1].mxu0  ;;  %v323_v27 = vld [vmem:[#allocation6 + $0xa0] sm:$0xff]  ;;  %v324_v28 = vld [vmem:[#allocation6 + $0xa8] sm:$0xff] }
 0x12e   :  { %v325_v30 = vld [vmem:[#allocation6 + $0xb0] sm:$0xff] }
 0x12f   :  { %178 = vadd.xlane.f32.xlu0 %v173_v29  ;;  %v930_v32 = vpack.c.bf16 %v326_v31, %v325_v30  ;;  %v652_v31 = vld [vmem:[%s1308_s3 + $0x1] ss:$0 sm:$0xff] }
 0x1bc   :  { %v179_v39 = vpop.xlane.xlu0 %178 }
 0x1bd   :  { %v180_v40 = vmul.f32 0.03125, %v179_v39  ;;  %v331_v39 = vld [vmem:[#allocation6 + $0xe0] sm:$0xff] }
 0x1bf   :  { %v181_v42 = vsub.f32 %v173_v29, %v180_v40  ;;  %v927_v29 = vpack.c.bf16 %v324_v28, %v323_v27  ;;  %v332_v40 = vld [vmem:[#allocation6 + $0xe8] sm:$0xff] }
 0x1c1   :  { %v182_v43 = vmul.f32 %v1215_v41, %v181_v42  ;;  %928 = vmatpush3.bf16.msra.mxu0 %v927_v29  ;;  %v333_v42 = vld [vmem:[#allocation6 + $0xf0] sm:$0xff] }
 0x1c2   :  { %929 = vmatprep.subr.bf16.mxu0 %v1084_v0 }
 0x1c3   :  { %v183_v44 = vmul.f32 %v182_v43, %v182_v43 }
 0x1c5   :  { %184 = vadd.xlane.f32.xlu0 %v183_v44  ;;  %931 = vmatpush3.bf16.msra.mxu0 %v930_v32  ;;  %v334_v44 = vld [vmem:[#allocation6 + $0xf8] sm:$0xff] }
 0x1c6   :  { %932 = vmatprep.subr.bf16.mxu0 %v1084_v0  ;;  %v942_v45 = vpack.c.bf16 %v334_v44, %v333_v42 }
 0x1c9   :  { %934 = vmatpush3.bf16.msra.mxu0 %v933_v35 }
 0x1ca   :  { %935 = vmatprep.subr.bf16.mxu0 %v1084_v0 }
 0x1cd   :  { %937 = vmatpush3.bf16.msra.mxu0 %v936_v38 }
 0x1ce   :  { %938 = vmatprep.subr.bf16.mxu0 %v1084_v0 }
 0x252   :  { %v185_v63 = vpop.xlane.xlu0 %184 }
 0x253   :  { %v186_v2 = vmul.f32 0.03125, %v185_v63  ;;  %v945_v63 = vpack.c.bf16 %v437_v62, %v436_v61 }
 0x255   :  { %v187_v3 = vadd.f32 1e-05, %v186_v2  ;;  %v439_v2 = vld [vmem:[#allocation8 + $0x98] sm:$0xff] }
 0x257   :  { %977 = vrsqrt.f32 %v187_v3 }
 0x261   :  { %v978_v4 = vpop.eup %977 }
 0x262   :  { %v189_v6 = vmul.f32 %v978_v4, %v182_v43  ;;  %v939_v43 = vpack.c.bf16 %v332_v40, %v331_v39 }
 0x264   :  { %v194_v8 = vmul.f32 %v646_v5, %v189_v6  ;;  %940 = vmatpush3.bf16.msra.mxu0 %v939_v43 }
 0x265   :  { %941 = vmatprep.subr.bf16.mxu0 %v1084_v0 }
 0x266   :  { %v199_v9 = vadd.f32 %v647_v7, %v194_v8  ;;  %v440_v8 = vld [vmem:[#allocation8 + $0xa0] sm:$0xff] }
 0x268   :  { %v200_v10 = vmax.f32 %v199_v9, 0.0  ;;  %943 = vmatpush3.bf16.msra.mxu0 %v942_v45  ;;  %v441_v9 = vld [vmem:[#allocation8 + $0xa8] sm:$0xff] }
 0x269   :  { %867 = vmatprep.subr.mxu0 %v1086_v1 }
 0x26a   :  { %795 = vmatmul.mubr.f32.vlgmr.msra.gmra.mrb[0].mxu1 %v200_v10  ;;  %v951_v10 = vpack.c.bf16 %v441_v9, %v440_v8 }
 0x26b   :  { %864 = vmatprep.mubr.msk.f32.mxu1 %vm1085_vm0, %v1086_v1  ;;  %946 = vmatpush3.bf16.msra.mxu1 %v945_v63 }
 0x26c   :  { %947 = vmatprep.subr.bf16.mxu1 %v1084_v0 }
 0x33d   :  { %v288_v12 = vpop.f32.mrb[0].mxu1 }
 0x33e   :  { %v289_v13 = vadd.f32 %v648_v11, %v288_v12  ;;  %v796_v14 = vpop.f32.mrb[1].mxu1  ;;  %v442_v11 = vld [vmem:[#allocation8 + $0xb0] sm:$0xff]  ;;  %v443_v12 = vld [vmem:[#allocation8 + $0xb8] sm:$0xff] }
 0x33f   :  { %v444_v14 = vld [vmem:[#allocation8 + $0xc0] sm:$0xff] }
 0x340   :  { %294 = vadd.xlane.f32.xlu1 %v289_v13  ;;  %v957_v16 = vpack.c.bf16 %v445_v15, %v444_v14 }
 0x3cd   :  { %v295_v21 = vpop.xlane.xlu1 %294 }
 0x3ce   :  { %v296_v22 = vmul.f32 0.03125, %v295_v21  ;;  %v449_v21 = vld [vmem:[#allocation8 + $0xe8] sm:$0xff] }
 0x3d0   :  { %v297_v23 = vsub.f32 %v289_v13, %v296_v22  ;;  %v954_v13 = vpack.c.bf16 %v443_v12, %v442_v11  ;;  %v963_v22 = vpack.c.bf16 %v449_v21, %v448_v20 }
 0x3d2   :  { %v298_v24 = vmul.f32 %v1215_v41, %v297_v23  ;;  %v450_v23 = vld [vmem:[#allocation8 + $0xf0] sm:$0xff] }
 0x3d4   :  { %v299_v25 = vmul.f32 %v298_v24, %v298_v24 }
 0x3d6   :  { %300 = vadd.xlane.f32.xlu1 %v299_v25 }
 0x463   :  { %v301_v46 = vpop.xlane.xlu1 %300 }
 0x464   :  { %v302_v47 = vmul.f32 0.03125, %v301_v46 }
 0x466   :  { %v303_v48 = vadd.f32 1e-05, %v302_v47 }
 0x468   :  { %979 = vrsqrt.f32 %v303_v48 }
 0x472   :  { %v980_v49 = vpop.eup %979 }
 0x473   :  { %v305_v51 = vmul.f32 %v980_v49, %v298_v24  ;;  %v451_v24 = vld [vmem:[#allocation8 + $0xf8] sm:$0xff] }
 0x474   :  { %v966_v25 = vpack.c.bf16 %v451_v24, %v450_v23 }
 0x475   :  { %v310_v53 = vmul.f32 %v649_v50, %v305_v51  ;;  %v655_v50 = vld [vmem:[%s1312_s7 + $0x1] ss:$0 sm:$0xff]  ;;  %s1087_s7 = smov [#allocation9]  }
 0x476   :  { %s634_s28 = sshll.u32 %s1087_s7, 4  ;;  %s635_s28 = int_to_ptr.vmem [resolvable:$true] %s634_s28 }
 0x477   :  { %v315_v54 = vadd.f32 %v650_v52, %v310_v53  ;;  %v656_v52 = vld [vmem:[%s1313_s8 + $0x1] ss:$0 sm:$0xff]  ;;  %s1051_s8 = scalar_lea.vmem %s635_s28, 16  ;;  %s1055_s15 = scalar_lea.vmem %s635_s28, 32 }
 0x478   :  { %p1052_p10 = scmp.ne.s32.totalorder %s635_s28, %s1051_s8  ;;  %p1056_p11 = scmp.lt.s32.totalorder %s635_s28, %s635_s28 }
 0x479   :  { %v1251_v55 = vadd.f32 %v315_v54, %v1203_v26  ;;  %v438_v26 = vld [vmem:[#allocation8 + $0x90] sm:$0xff]  ;;  %p1057_p12 = scmp.lt.s32.totalorder %s1055_s15, %s1051_s8 }
 0x47a   :  { %v948_v3 = vpack.c.bf16 %v439_v2, %v438_v26 }
 0x47b   :  { %v317_v56 = vmax.f32 %v1251_v55, 0.0  ;;  %p1058_p13 = por %p1057_p12, %p1056_p11 }
 0x47c   :  { %949 = vmatpush3.bf16.msra.mxu1 %v948_v3 }
 0x47d   :  { %830 = vmatmul.mubr.f32.vlgmr.msra.gmra.mrb[2].mxu0 %v317_v56  ;;  %950 = vmatprep.subr.bf16.mxu1 %v1084_v0  ;;  %p1059_p0 = pnand %p1058_p13, %p1052_p10 }
 0x47e   :  { %869 = vmatprep.mubr.msk.f32.mxu0 %vm1085_vm0, %v1086_v1 }
 0x480   :  { %952 = vmatpush3.bf16.msra.mxu1 %v951_v10 }
 0x481   :  { %953 = vmatprep.subr.bf16.mxu1 %v1084_v0 }
 0x484   :  { %955 = vmatpush3.bf16.msra.mxu1 %v954_v13 }
 0x485   :  { %956 = vmatprep.subr.bf16.mxu1 %v1084_v0 }
 0x488   :  { %958 = vmatpush3.bf16.msra.mxu1 %v957_v16 }
 0x489   :  { %959 = vmatprep.subr.bf16.mxu1 %v1084_v0 }
 0x48c   :  { %961 = vmatpush3.bf16.msra.mxu1 %v960_v19 }
 0x48d   :  { %962 = vmatprep.subr.bf16.mxu1 %v1084_v0 }
 0x490   :  { %964 = vmatpush3.bf16.msra.mxu1 %v963_v22 }
 0x491   :  { %965 = vmatprep.subr.bf16.mxu1 %v1084_v0  ;;  %v654_v0 = vld [vmem:[%s1311_s6 + $0x1] ss:$0 sm:$0xff] }
 0x494   :  { %967 = vmatpush3.bf16.msra.mxu1 %v966_v25 }
 0x550   :  { %v406_v58 = vpop.f32.mrb[2].mxu0 }
 0x551   :  { %v407_v59 = vadd.f32 %v651_v57, %v406_v58  ;;  %v831_v60 = vpop.f32.mrb[3].mxu0  ;;  %v553_v58 = vld [vmem:[%s1314_s9] sm:$0x1] }
 0x553   :  { %412 = vadd.xlane.f32.xlu0 %v407_v59 }
 0x5e0   :  { %v413_v1 = vpop.xlane.xlu0 %412 }
 0x5e1   :  { %v414_v4 = vmul.f32 0.03125, %v413_v1 }
 0x5e3   :  { %v415_v5 = vsub.f32 %v407_v59, %v414_v4  ;;  %v555_v59 = vstv %s1315_s10 }
 0x5e5   :  { %v416_v6 = vmul.f32 %v1215_v41, %v415_v5 }
 0x5e7   :  { %v417_v7 = vmul.f32 %v416_v6, %v416_v6 }
 0x5e9   :  { %418 = vadd.xlane.f32.xlu1 %v417_v7 }
 0x676   :  { %v419_v27 = vpop.xlane.xlu1 %418 }
 0x677   :  { %v420_v28 = vmul.f32 0.03125, %v419_v27 }
 0x679   :  { %v421_v29 = vadd.f32 1e-05, %v420_v28 }
 0x67b   :  { %981 = vrsqrt.f32 %v421_v29 }
 0x685   :  { %v982_v30 = vpop.eup %981 }
 0x686   :  { %v423_v32 = vmul.f32 %v982_v30, %v416_v6 }
 0x688   :  { %v428_v34 = vmul.f32 %v652_v31, %v423_v32 }
 0x68a   :  { %v433_v35 = vadd.f32 %v653_v33, %v428_v34 }
 0x68c   :  { %v434_v36 = vmax.f32 %v433_v35, 0.0 }
 0x68e   :  { %865 = vmatmul.mubr.f32.vlgmr.msra.gmra.mrb[2].mxu1 %v434_v36 }
 0x761   :  { %v523_v37 = vpop.f32.mrb[2].mxu1 }
 0x762   :  { %v524_v38 = vadd.f32 %v654_v0, %v523_v37  ;;  %v866_v39 = vpop.f32.mrb[3].mxu1 }
 0x764   :  { %529 = vadd.xlane.f32.xlu0 %v524_v38 }
 0x7f1   :  { %v530_v40 = vpop.xlane.xlu0 %529 }
 0x7f2   :  { %v531_v42 = vmul.f32 0.03125, %v530_v40 }
 0x7f4   :  { %v532_v43 = vsub.f32 %v524_v38, %v531_v42 }
 0x7f6   :  { %v533_v44 = vmul.f32 %v1215_v41, %v532_v43 }
 0x7f8   :  { %v534_v45 = vmul.f32 %v533_v44, %v533_v44 }
 0x7fa   :  { %535 = vadd.xlane.f32.xlu1 %v534_v45 }
 0x887   :  { %v536_v46 = vpop.xlane.xlu1 %535 }
 0x888   :  { %v537_v47 = vmul.f32 0.03125, %v536_v46 }
 0x88a   :  { %v538_v48 = vadd.f32 1e-05, %v537_v47 }
 0x88c   :  { %983 = vrsqrt.f32 %v538_v48 }
 0x896   :  { %v984_v49 = vpop.eup %983 }
 0x897   :  { %v540_v51 = vmul.f32 %v984_v49, %v533_v44 }
 0x899   :  { %v545_v53 = vmul.f32 %v655_v50, %v540_v51 }
 0x89b   :  { %v550_v54 = vadd.f32 %v656_v52, %v545_v53 }
 0x89d   :  { %v551_v41 = vadd.f32 %v550_v54, %v317_v56 }
 0x89f   :  { %v552_v57 = vmax.f32 %v551_v41, 0.0 }
 0x8a1   :  { %868 = vmatpush3.xpose.msra.mxu0 %v552_v57 }
 0x8a4   :  { %870 = vmatmul.mubr.f32.vlgmr.msra.gmra.mrb[4].mxu0 %v553_v58 }
 0x977   :  { %v622_v60 = vpop.f32.mrb[4].mxu0 }
 0x978   :  { %v623_v61 = vadd.f32 %v622_v60, %v555_v59  ;;  %v871_v62 = vpop.f32.mrb[5].mxu0 }
 0x97a   :  { %627 = vst.msk [vmem:[#allocation9] sm:$0x1] %vm626_vm2, %v623_v61 }
 0x97b   :  { %1062 = shalt.err (!%p1059_p0)
}
 0x97c   :  { %s1063_s10 = scalar_lea.hbm %s1316_s11, 16 }
 0x97d   :  { %p1064_p1 = scmp.ne.s32.totalorder %s1316_s11, %s1063_s10  ;;  %p1067_p2 = scmp.lt.u32.totalorder %s1063_s10, %s1316_s11 }
 0x97f   :  { %p1069_p3 = pnand %p1067_p2, %p1064_p1 }
 0x981   :  { %1072 = shalt.err (!%p1069_p3)
}
 0x982   :  { %637 = dma.vmem_to_hbm [thread:$0]  %s635_s28, 16, %s1316_s11, [#allocation5]  }
 0x983   :  { %1077 = dma.done.wait [#allocation5], 16  }
 0x984   :  { %1078 = vsyncadd [#allocation5], 4294967280 }
 0x985   :  { %641 = vsyncpa [#allocation4], 1 }
 0x986   :  { %642 = vsyncpa [#allocation7], 1 }
 0x987   :  { %643 = vsyncpa [#allocation5], 1 }

</bundles_post_ra>
